<compile_context>
chip_gen: v5e
topology: v5e:2x2
jax: 0.10.0
libtpu: 0.0.40
codegen_flags: <defaults>
</compile_context>

<pallas_src>
import functools
from typing import NamedTuple

import jax
import jax.numpy as jnp
from jax.experimental import pallas as pl
from jax.experimental.pallas import tpu as pltpu


def _round_up(n, m):
    return (n + m - 1) // m * m


def _vmem_capacity_bytes():
    try:
        return int(pltpu.get_tpu_info().vmem_capacity_bytes)
    except Exception:
        return 64 * 1024 * 1024  # conservative fallback (v7x per-TensorCore)


def _tensorcores_per_device():
    try:
        kind = jax.devices()[0].device_kind.lower()
        if "v7" in kind:  # v7x: 2 TensorCores per chip
            return 2
    except Exception:
        pass
    return 1


def _estimate_vmem_bytes(Bp, Dp, th, tp, nbuf):
    """Rough per-step VMEM working set (bytes) for a given tiling."""
    x_b = Bp * Dp * 2                 # resident x (bf16)
    w1_b = nbuf * Dp * th * 2         # pipelined w1 H-tile (bf16)
    w2_b = nbuf * th * tp * 2         # pipelined w2 H-tile (bf16)
    gb_b = nbuf * 2 * th * 4          # gamma / beta H-tiles (f32)
    b2_b = 2 * tp * 4                 # b2 (f32)
    out_b = 2 * Bp * tp * 4           # resident output block (f32)
    tmp_b = 3 * Bp * th * 4           # h / hc / r temporaries (f32)
    return x_b + w1_b + w2_b + gb_b + b2_b + out_b + tmp_b


class PredictionConfig(NamedTuple):
    D: int
    H: int
    P: int
    Dp: int
    Hp: int
    Pp: int
    th: int           # H tile (reduction axis)
    tp: int           # P tile (parallel axis)
    num_p: int
    weight_buffers: int
    vmem_limit: int
    eps: float


def prediction_kernel(x_ref, w1_ref, gamma_ref, beta_ref, w2_ref, b2_ref, o_ref,
                      *, inv_b, eps, batch):
    """Grid = (P tiles [parallel], H tiles [reduction]). One step = one H tile."""
    j = pl.program_id(1)  # H (reduction) axis — innermost

    # ---- Linear 1 (bias-free: b1 is cancelled exactly by the BN batch-mean
    # subtraction). bf16 operands on the MXU, f32 accumulation.
    h = jnp.dot(x_ref[...], w1_ref[...], preferred_element_type=jnp.float32)  # (Bp, th)

    # ---- BatchNorm1d (training mode), exact two-pass statistics.
    # Padded batch rows of x are zero, so column sums equal the real-batch sums;
    # divide by the real batch size. Padded rows are masked out of the variance.
    mean = jnp.sum(h, axis=0, keepdims=True) * inv_b                     # (1, th)
    row_ids = jax.lax.broadcasted_iota(jnp.int32, h.shape, 0)
    hc = jnp.where(row_ids < batch, h - mean, 0.0)                       # centered, masked
    var = jnp.sum(hc * hc, axis=0, keepdims=True) * inv_b                # biased variance

    # ---- fused normalize + affine + ReLU (one FMA + max per element).
    scale = jax.lax.rsqrt(var + eps) * gamma_ref[...]
    r = jnp.maximum(hc * scale + beta_ref[...], 0.0)

    # ---- Linear 2 partial product for this H tile, accumulated into the
    # VMEM-resident output block (f32).
    partial = jnp.dot(r.astype(jnp.bfloat16), w2_ref[...],
                      preferred_element_type=jnp.float32)

    @pl.when(j == 0)
    def _():
        o_ref[...] = partial + b2_ref[...]

    @pl.when(j > 0)
    def _():
        o_ref[...] += partial


def prepare_params(w1, b1, gamma, beta, w2, b2, *, eps=1e-5, max_batch=128,
                   tile_h_max=512):
    """Pad + cast the static operands ONCE; returns (padded params, config).

    w1: (D, H), w2: (H, P) — pre-transposed vs. PyTorch's (out, in) layout.
    b1 is dropped (cancelled by the training-mode BN batch-mean subtraction).
    """
    del b1
    f32, bf16 = jnp.float32, jnp.bfloat16
    w1 = jnp.asarray(w1, f32)
    w2 = jnp.asarray(w2, f32)
    D, H = w1.shape
    P = w2.shape[1]

    Dp = _round_up(D, 128)
    Hp0 = _round_up(H, 128)
    Pp = _round_up(P, 128)

    # --- parallel split of P across TensorCores (v7x) when worthwhile.
    num_p = 2 if (_tensorcores_per_device() >= 2 and Pp >= 256 and Pp % 256 == 0) else 1
    tp = Pp // num_p

    # --- VMEM-budget-aware H tile selection (generation-aware).
    vmem_cap = _vmem_capacity_bytes()
    budget = int(0.7 * vmem_cap)
    Bp_est = max(_round_up(max_batch, 16), 16)
    th = 128
    cand = min(_round_up(tile_h_max, 128), Hp0)
    while cand >= 128:
        if _estimate_vmem_bytes(Bp_est, Dp, cand, tp, 2) <= budget:
            th = cand
            break
        cand -= 128

    # Pad Hp UP to a multiple of th (padded H columns are inert: zero w1 cols,
    # zero w2 rows, gamma/beta padded with zeros).
    Hp = _round_up(Hp0, th)
    num_h = Hp // th

    # Deeper weight-tile pipelining only if there are enough steps and headroom.
    weight_buffers = 2
    if num_h >= 3 and _estimate_vmem_bytes(Bp_est, Dp, th, tp, 3) <= budget:
        weight_buffers = 3

    vmem_limit = int(min(0.9 * vmem_cap, 128 * 1024 * 1024))

    w1p = jnp.zeros((Dp, Hp), bf16).at[:D, :H].set(w1.astype(bf16))
    w2p = jnp.zeros((Hp, Pp), bf16).at[:H, :P].set(w2.astype(bf16))
    gp = jnp.zeros((1, Hp), f32).at[:, :H].set(jnp.reshape(gamma, (1, H)).astype(f32))
    bp = jnp.zeros((1, Hp), f32).at[:, :H].set(jnp.reshape(beta, (1, H)).astype(f32))
    b2p = jnp.zeros((1, Pp), f32).at[:, :P].set(jnp.reshape(b2, (1, P)).astype(f32))

    cfg = PredictionConfig(D=D, H=H, P=P, Dp=Dp, Hp=Hp, Pp=Pp, th=th, tp=tp,
                           num_p=num_p, weight_buffers=weight_buffers,
                           vmem_limit=vmem_limit, eps=float(eps))
    return (w1p, gp, bp, w2p, b2p), cfg


def _prediction_forward(x, params, cfg):
    """x: (B, D) f32 -> (B, P) f32. Only x is padded/cast per call."""
    w1p, gp, bp, w2p, b2p = params
    B, D = x.shape
    assert D == cfg.D

    # bf16 sublane packing is (16, 128): round the batch to a multiple of 16.
    Bp = max(_round_up(B, 16), 16)
    xp = jnp.zeros((Bp, cfg.Dp), jnp.bfloat16).at[:B, :D].set(x.astype(jnp.bfloat16))

    num_h = cfg.Hp // cfg.th
    kernel = functools.partial(prediction_kernel, inv_b=1.0 / B, eps=cfg.eps, batch=B)

    # Optional deeper pipelining on the streamed weight tiles.
    wspec_kwargs = {}
    if cfg.weight_buffers > 2:
        wspec_kwargs["pipeline_mode"] = pl.Buffered(cfg.weight_buffers)

    flops = int(2 * Bp * cfg.Hp * (cfg.Dp * cfg.num_p + cfg.Pp))
    bytes_accessed = int(xp.size * 2 + w1p.size * 2 + w2p.size * 2
                         + (gp.size + bp.size + b2p.size) * 4 + Bp * cfg.Pp * 4)
    cost = pl.CostEstimate(flops=flops, transcendentals=int(cfg.num_p * cfg.Hp),
                           bytes_accessed=bytes_accessed)

    out = pl.pallas_call(
        kernel,
        out_shape=jax.ShapeDtypeStruct((Bp, cfg.Pp), jnp.float32),
        grid_spec=pltpu.PrefetchScalarGridSpec(
            num_scalar_prefetch=0,
            grid=(cfg.num_p, num_h),
            in_specs=[
                pl.BlockSpec((Bp, cfg.Dp), lambda p, j: (0, 0)),            # x (resident; full batch for BN stats)
                pl.BlockSpec((cfg.Dp, cfg.th), lambda p, j: (0, j), **wspec_kwargs),  # w1 H-tile
                pl.BlockSpec((1, cfg.th), lambda p, j: (0, j)),             # gamma H-tile
                pl.BlockSpec((1, cfg.th), lambda p, j: (0, j)),             # beta  H-tile
                pl.BlockSpec((cfg.th, cfg.tp), lambda p, j: (j, p), **wspec_kwargs),  # w2 (H,P) tile
                pl.BlockSpec((1, cfg.tp), lambda p, j: (0, p)),             # b2 P-tile
            ],
            # Output block index is constant along j -> resident accumulator.
            out_specs=pl.BlockSpec((Bp, cfg.tp), lambda p, j: (0, p)),
        ),
        compiler_params=pltpu.CompilerParams(
            dimension_semantics=("parallel", "arbitrary"),
            vmem_limit_bytes=cfg.vmem_limit),
        cost_estimate=cost,
    )(xp, w1p, gp, bp, w2p, b2p)

    return out[:B, :cfg.P]


prediction_network = jax.jit(_prediction_forward, static_argnums=(2,))


# ----------------------------------------------------------------------------
# Synthetic init + pure-JAX references for verification.
# ----------------------------------------------------------------------------
def init_params(key, dimension, hidden_size, prediction_size):
    """Deterministic synthetic init (PyTorch-like uniform fan-in scaling)."""
    k1, k2, k3, k4 = jax.random.split(key, 4)
    bound1 = 1.0 / jnp.sqrt(dimension)
    bound2 = 1.0 / jnp.sqrt(hidden_size)
    # weights stored pre-transposed: (in, out)
    w1 = jax.random.uniform(k1, (dimension, hidden_size), jnp.float32, -bound1, bound1)
    b1 = jax.random.uniform(k2, (1, hidden_size), jnp.float32, -bound1, bound1)
    w2 = jax.random.uniform(k3, (hidden_size, prediction_size), jnp.float32, -bound2, bound2)
    b2 = jax.random.uniform(k4, (1, prediction_size), jnp.float32, -bound2, bound2)
    gamma = jnp.ones((1, hidden_size), jnp.float32)   # BN weight init
    beta = jnp.zeros((1, hidden_size), jnp.float32)   # BN bias init
    return w1, b1, gamma, beta, w2, b2


def reference_f32(x, w1, b1, gamma, beta, w2, b2, eps=1e-5):
    """Exact f32 PyTorch-semantics reference (training-mode BatchNorm1d)."""
    h = x @ w1 + b1.reshape(1, -1)
    mean = h.mean(axis=0, keepdims=True)
    var = ((h - mean) ** 2).mean(axis=0, keepdims=True)
    hn = (h - mean) / jnp.sqrt(var + eps) * gamma.reshape(1, -1) + beta.reshape(1, -1)
    r = jnp.maximum(hn, 0.0)
    return r @ w2 + b2.reshape(1, -1)


def reference_bf16_matmul(x, w1, b1, gamma, beta, w2, b2, eps=1e-5):
    """Same math with matmul operands quantized to bf16 (as the kernel feeds
    the MXU) and f32 accumulation / f32 BN math."""
    q = lambda a: a.astype(jnp.bfloat16).astype(jnp.float32)
    h = q(x) @ q(w1) + b1.reshape(1, -1)
    mean = h.mean(axis=0, keepdims=True)
    var = ((h - mean) ** 2).mean(axis=0, keepdims=True)
    hn = (h - mean) * jax.lax.rsqrt(var + eps) * gamma.reshape(1, -1) + beta.reshape(1, -1)
    r = jnp.maximum(hn, 0.0)
    return q(r) @ q(w2) + b2.reshape(1, -1)


if __name__ == "__main__":
    B, dimension, hidden_size, prediction_size = 8, 32, 64, 32

    key = jax.random.PRNGKey(0)
    kx, kp = jax.random.split(key)
    x = jax.random.normal(kx, (B, dimension), jnp.float32)
    raw_params = init_params(kp, dimension, hidden_size, prediction_size)

    # Pad/cast static operands ONCE (cacheable across calls), then run.
    params, cfg = prepare_params(*raw_params)
    out = prediction_network(x, params, cfg)
    out = jax.block_until_ready(out)

    ref_q = reference_bf16_matmul(x, *raw_params)  # matches kernel's bf16 MXU inputs
    ref_f = reference_f32(x, *raw_params)          # exact PyTorch-semantics f32

    assert out.shape == (B, prediction_size)
    assert jnp.allclose(out, ref_q, atol=1e-2, rtol=1e-2), "mismatch vs bf16-matmul reference"
    assert jnp.allclose(out, ref_f, atol=5e-2, rtol=5e-2), "mismatch vs f32 reference"

    print("KERNEL_OK")
</pallas_src>

<mosaic_0001>
module attributes {stable_mosaic.version = 11 : i64} {
  func.func @prediction_kernel(%arg0: i32, %arg1: i32, %arg2: memref<16x128xbf16, #tpu.memory_space<vmem>>, %arg3: memref<128x128xbf16, #tpu.memory_space<vmem>>, %arg4: memref<1x128xf32, #tpu.memory_space<vmem>>, %arg5: memref<1x128xf32, #tpu.memory_space<vmem>>, %arg6: memref<128x128xbf16, #tpu.memory_space<vmem>>, %arg7: memref<1x128xf32, #tpu.memory_space<vmem>>, %arg8: memref<16x128xf32, #tpu.memory_space<vmem>>) attributes {dimension_semantics = [#tpu.dimension_semantics<parallel>, #tpu.dimension_semantics<arbitrary>], iteration_bounds = array<i64: 1, 1>, scalar_prefetch = 0 : i64, scratch_operands = 0 : i64, tpu.core_type = #tpu.core_type<tc>, window_params = [{pipeline_mode = #tpu.pipeline_mode<synchronous>, transform_indices = @transform_0, window_bounds = array<i64: 16, 128>}, {transform_indices = @transform_1, window_bounds = array<i64: 128, 128>}, {transform_indices = @transform_2, window_bounds = array<i64: 1, 128>}, {transform_indices = @transform_3, window_bounds = array<i64: 1, 128>}, {transform_indices = @transform_4, window_bounds = array<i64: 128, 128>}, {transform_indices = @transform_5, window_bounds = array<i64: 1, 128>}, {transform_indices = @transform_6, window_bounds = array<i64: 16, 128>}]} {
    %c0 = arith.constant 0 : index
    %c0_0 = arith.constant 0 : index
    %0 = vector.load %arg2[%c0, %c0_0] : memref<16x128xbf16, #tpu.memory_space<vmem>>, vector<16x128xbf16>
    %c0_1 = arith.constant 0 : index
    %c0_2 = arith.constant 0 : index
    %1 = vector.load %arg3[%c0_1, %c0_2] : memref<128x128xbf16, #tpu.memory_space<vmem>>, vector<128x128xbf16>
    %cst = arith.constant dense<0.000000e+00> : vector<16x128xf32>
    %2 = tpu.matmul %0, %1, %cst {dimension_numbers = #tpu.dot_dimension_numbers<[1], [0], [0], [1], [0, 0, 1, 1], [], []>} : vector<16x128xbf16>, vector<128x128xbf16>, vector<16x128xf32> -> vector<16x128xf32>
    %cst_3 = arith.constant dense<0.000000e+00> : vector<128xf32>
    %3 = vector.multi_reduction <add>, %2, %cst_3 [0] : vector<16x128xf32> to vector<128xf32>
    %4 = vector.shape_cast %3 : vector<128xf32> to vector<1x128xf32>
    %cst_4 = arith.constant 1.250000e-01 : f32
    %5 = vector.broadcast %cst_4 : f32 to vector<1x128xf32>
    %6 = arith.mulf %4, %5 : vector<1x128xf32>
    %7 = tpu.iota {dimensions = array<i32: 0>} : vector<16x128xi32>
    %c8_i32 = arith.constant 8 : i32
    %8 = vector.broadcast %c8_i32 : i32 to vector<16x128xi32>
    %9 = arith.cmpi slt, %7, %8 : vector<16x128xi32>
    %10 = vector.broadcast %6 : vector<1x128xf32> to vector<16x128xf32>
    %11 = arith.subf %2, %10 : vector<16x128xf32>
    %cst_5 = arith.constant 0.000000e+00 : f32
    %12 = vector.broadcast %cst_5 : f32 to vector<16x128xf32>
    %13 = arith.select %9, %11, %12 : vector<16x128xi1>, vector<16x128xf32>
    %14 = arith.mulf %13, %13 : vector<16x128xf32>
    %cst_6 = arith.constant dense<0.000000e+00> : vector<128xf32>
    %15 = vector.multi_reduction <add>, %14, %cst_6 [0] : vector<16x128xf32> to vector<128xf32>
    %16 = vector.shape_cast %15 : vector<128xf32> to vector<1x128xf32>
    %cst_7 = arith.constant 1.250000e-01 : f32
    %17 = vector.broadcast %cst_7 : f32 to vector<1x128xf32>
    %18 = arith.mulf %16, %17 : vector<1x128xf32>
    %cst_8 = arith.constant 9.99999974E-6 : f32
    %19 = vector.broadcast %cst_8 : f32 to vector<1x128xf32>
    %20 = arith.addf %18, %19 : vector<1x128xf32>
    %21 = math.rsqrt %20 : vector<1x128xf32>
    %c0_9 = arith.constant 0 : index
    %c0_10 = arith.constant 0 : index
    %22 = vector.load %arg4[%c0_9, %c0_10] : memref<1x128xf32, #tpu.memory_space<vmem>>, vector<1x128xf32>
    %23 = arith.mulf %21, %22 : vector<1x128xf32>
    %24 = vector.broadcast %23 : vector<1x128xf32> to vector<16x128xf32>
    %25 = arith.mulf %13, %24 : vector<16x128xf32>
    %c0_11 = arith.constant 0 : index
    %c0_12 = arith.constant 0 : index
    %26 = vector.load %arg5[%c0_11, %c0_12] : memref<1x128xf32, #tpu.memory_space<vmem>>, vector<1x128xf32>
    %27 = vector.broadcast %26 : vector<1x128xf32> to vector<16x128xf32>
    %28 = arith.addf %25, %27 : vector<16x128xf32>
    %cst_13 = arith.constant 0.000000e+00 : f32
    %29 = vector.broadcast %cst_13 : f32 to vector<16x128xf32>
    %30 = arith.maximumf %28, %29 : vector<16x128xf32>
    %31 = arith.truncf %30 : vector<16x128xf32> to vector<16x128xbf16>
    %c0_14 = arith.constant 0 : index
    %c0_15 = arith.constant 0 : index
    %32 = vector.load %arg6[%c0_14, %c0_15] : memref<128x128xbf16, #tpu.memory_space<vmem>>, vector<128x128xbf16>
    %cst_16 = arith.constant dense<0.000000e+00> : vector<16x128xf32>
    %33 = tpu.matmul %31, %32, %cst_16 {dimension_numbers = #tpu.dot_dimension_numbers<[1], [0], [0], [1], [0, 0, 1, 1], [], []>} : vector<16x128xbf16>, vector<128x128xbf16>, vector<16x128xf32> -> vector<16x128xf32>
    %c0_i32 = arith.constant 0 : i32
    %34 = arith.cmpi eq, %arg1, %c0_i32 : i32
    %35 = arith.extui %34 : i1 to i32
    %c0_i32_17 = arith.constant 0 : i32
    %36 = arith.cmpi ne, %35, %c0_i32_17 : i32
    scf.if %36 {
      %c0_20 = arith.constant 0 : index
      %c0_21 = arith.constant 0 : index
      %40 = vector.load %arg7[%c0_20, %c0_21] : memref<1x128xf32, #tpu.memory_space<vmem>>, vector<1x128xf32>
      %41 = vector.broadcast %40 : vector<1x128xf32> to vector<16x128xf32>
      %42 = arith.addf %33, %41 : vector<16x128xf32>
      %c0_22 = arith.constant 0 : index
      %c0_23 = arith.constant 0 : index
      %43 = vector.load %arg8[%c0_22, %c0_23] : memref<16x128xf32, #tpu.memory_space<vmem>>, vector<16x128xf32>
      tpu.vector_store %arg8[%c0_22, %c0_23], %42 {strides = array<i32>} : memref<16x128xf32, #tpu.memory_space<vmem>>, vector<16x128xf32>,
    } else {
    }
    %c0_i32_18 = arith.constant 0 : i32
    %37 = arith.cmpi sgt, %arg1, %c0_i32_18 : i32
    %38 = arith.extui %37 : i1 to i32
    %c0_i32_19 = arith.constant 0 : i32
    %39 = arith.cmpi ne, %38, %c0_i32_19 : i32
    scf.if %39 {
      %c0_20 = arith.constant 0 : index
      %c0_21 = arith.constant 0 : index
      %40 = vector.load %arg8[%c0_20, %c0_21] : memref<16x128xf32, #tpu.memory_space<vmem>>, vector<16x128xf32>
      %41 = arith.addf %40, %33 : vector<16x128xf32>
      %c0_22 = arith.constant 0 : index
      %c0_23 = arith.constant 0 : index
      %42 = vector.load %arg8[%c0_22, %c0_23] : memref<16x128xf32, #tpu.memory_space<vmem>>, vector<16x128xf32>
      tpu.vector_store %arg8[%c0_22, %c0_23], %41 {strides = array<i32>} : memref<16x128xf32, #tpu.memory_space<vmem>>, vector<16x128xf32>,
    } else {
    }
    return
  }
  func.func @transform_0(%arg0: i32, %arg1: i32) -> (i32, i32) {
    %c0_i32 = arith.constant 0 : i32
    %c0_i32_0 = arith.constant 0 : i32
    %c0_i32_1 = arith.constant 0 : i32
    return %c0_i32, %c0_i32_0 : i32, i32
  }
  func.func @transform_1(%arg0: i32, %arg1: i32) -> (i32, i32) {
    %c0_i32 = arith.constant 0 : i32
    %c0_i32_0 = arith.constant 0 : i32
    return %c0_i32, %arg1 : i32, i32
  }
  func.func @transform_2(%arg0: i32, %arg1: i32) -> (i32, i32) {
    %c0_i32 = arith.constant 0 : i32
    %c0_i32_0 = arith.constant 0 : i32
    return %c0_i32, %arg1 : i32, i32
  }
  func.func @transform_3(%arg0: i32, %arg1: i32) -> (i32, i32) {
    %c0_i32 = arith.constant 0 : i32
    %c0_i32_0 = arith.constant 0 : i32
    return %c0_i32, %arg1 : i32, i32
  }
  func.func @transform_4(%arg0: i32, %arg1: i32) -> (i32, i32) {
    %c0_i32 = arith.constant 0 : i32
    return %arg1, %arg0 : i32, i32
  }
  func.func @transform_5(%arg0: i32, %arg1: i32) -> (i32, i32) {
    %c0_i32 = arith.constant 0 : i32
    %c0_i32_0 = arith.constant 0 : i32
    return %c0_i32, %arg0 : i32, i32
  }
  func.func @transform_6(%arg0: i32, %arg1: i32) -> (i32, i32) {
    %c0_i32 = arith.constant 0 : i32
    %c0_i32_0 = arith.constant 0 : i32
    return %c0_i32, %arg0 : i32, i32
  }
}

</mosaic_0001>

<bundles_post_ra>
// kernel: _prediction_forward.1
= control target key start
LH: loop header
LB: loop body
LE: loop exit
PB: predicated region body
PF: predicated region fallthrough
CT: control target
= control target key end

     0   :  { %11 = vsyncpa [#allocation3], 0  ;;  %s507_s0 = inlined_call_operand.vmem [shape: bf16[16,128], index: 0, kind: input, shape index: {}]   ;;  %s508_s1 = inlined_call_operand.hbm [shape: bf16[128,128], index: 1, kind: input, shape index: {}]   ;;  %s509_s2 = inlined_call_operand.vmem [shape: f32[1,128], index: 2, kind: input, shape index: {}]   ;;  %s510_s3 = inlined_call_operand.vmem [shape: f32[1,128], index: 3, kind: input, shape index: {}]   ;;  %s511_s4 = inlined_call_operand.hbm [shape: bf16[128,128], index: 4, kind: input, shape index: {}]   ;;  %s512_s5 = inlined_call_operand.vmem [shape: f32[1,128], index: 5, kind: input, shape index: {}]   ;;  %s513_s6 = inlined_call_operand.vmem [shape: f32[16,128], index: 6, kind: output, shape index: {}]  }
   0x1   :  { %s19_s23 = sshll.u32 %s508_s1, 4  ;;  %s20_s23 = int_to_ptr.hbm [resolvable:$true] %s19_s23 }
   0x2   :  { %12 = vsyncpa [#allocation5], 0  ;;  %s444_s24 = smov [#allocation2]   ;;  %s36_s28 = sshll.u32 %s511_s4, 4  ;;  %s37_s28 = int_to_ptr.hbm [resolvable:$true] %s36_s28 }
   0x3   :  { %s21_s25 = sshll.u32 %s444_s24, 4  ;;  %s445_s29 = smov 64   ;;  %s22_s25 = int_to_ptr.vmem [resolvable:$true] %s21_s25 }
   0x4   :  { %s446_s30 = smov 4   ;;  %s447_s7 = smov [#allocation4]  }
   0x5   :  { %27 = dma.hbm_to_vmem [thread:$0]  %s20_s23, 1024, %s22_s25, [#allocation3], %s445_s29, %s445_s29, %s446_s30  }
   0x6   :  { %s38_s8 = sshll.u32 %s447_s7, 4  ;;  %s39_s8 = int_to_ptr.vmem [resolvable:$true] %s38_s8 }
   0x7   :  { %44 = dma.hbm_to_vmem [thread:$0]  %s37_s28, 1024, %s39_s8, [#allocation5], %s445_s29, %s445_s29, %s446_s30  }
   0x8   :  { %440 = dma.done.wait [#allocation3], 1024  }
   0x9   :  { %441 = vsyncadd [#allocation3], 4294966272 }
   0xa   :  { %442 = dma.done.wait [#allocation5], 1024  }
   0xb   :  { %443 = vsyncadd [#allocation5], 4294966272  ;;  %v375_v0 = vld [vmem:[#allocation2 + $0x38] sm:$0xff]  ;;  %v374_v1 = vld [vmem:[#allocation2 + $0x30] sm:$0xff] }
   0xc   :  { %127 = vmatpush.bf16.msra.mxu0 %v375_v0  ;;  %v373_v2 = vld [vmem:[#allocation2 + $0x28] sm:$0xff]  ;;  %v372_v3 = vld [vmem:[#allocation2 + $0x20] sm:$0xff]  ;;  %v371_v4 = vld [vmem:[#allocation2 + $0x18] sm:$0xff] }
   0xd   :  { %v370_v5 = vld [vmem:[#allocation2 + $0x10] sm:$0xff]  ;;  %v369_v6 = vld [vmem:[#allocation2 + $0x8] sm:$0xff]  ;;  %v368_v7 = vld [vmem:[#allocation2] sm:$0xff] }
   0xe   :  { %v367_v8 = vld [vmem:[%s507_s0] sm:$0xff]  ;;  %v383_v9 = vld [vmem:[#allocation4 + $0x38] sm:$0xff]  ;;  %v382_v10 = vld [vmem:[#allocation4 + $0x30] sm:$0xff] }
   0xf   :  { %257 = vmatpush.bf16.msra.mxu1 %v383_v9  ;;  %v381_v11 = vld [vmem:[#allocation4 + $0x28] sm:$0xff]  ;;  %v380_v13 = vld [vmem:[#allocation4 + $0x20] sm:$0xff]  ;;  %v379_v14 = vld [vmem:[#allocation4 + $0x18] sm:$0xff] }
  0x10   :  { %128 = vmatpush.bf16.msra.mxu0 %v374_v1  ;;  %v378_v17 = vld [vmem:[#allocation4 + $0x10] sm:$0xff]  ;;  %v377_v20 = vld [vmem:[#allocation4 + $0x8] sm:$0xff]  ;;  %v376_v23 = vld [vmem:[#allocation4] sm:$0xff] }
  0x11   :  { %v179_v43 = vld [vmem:[%s509_s2] sm:$0x1] }
  0x12   :  { %v388_v47 = vld [vmem:[%s510_s3] ss:$0 sm:$0xff] }
  0x13   :  { %258 = vmatpush.bf16.msra.mxu1 %v382_v10  ;;  %v389_v55 = vld [vmem:[%s512_s5] ss:$0 sm:$0xff] }
  0x14   :  { %129 = vmatpush.bf16.msra.mxu0 %v373_v2 }
  0x17   :  { %259 = vmatpush.bf16.msra.mxu1 %v381_v11 }
  0x18   :  { %130 = vmatpush.bf16.msra.mxu0 %v372_v3 }
  0x1b   :  { %260 = vmatpush.bf16.msra.mxu1 %v380_v13 }
  0x1c   :  { %131 = vmatpush.bf16.msra.mxu0 %v371_v4 }
  0x1f   :  { %261 = vmatpush.bf16.msra.mxu1 %v379_v14 }
  0x20   :  { %132 = vmatpush.bf16.msra.mxu0 %v370_v5 }
  0x23   :  { %262 = vmatpush.bf16.msra.mxu1 %v378_v17 }
  0x24   :  { %133 = vmatpush.bf16.msra.mxu0 %v369_v6 }
  0x27   :  { %263 = vmatpush.bf16.msra.mxu1 %v377_v20 }
  0x28   :  { %134 = vmatpush.bf16.msra.mxu0 %v368_v7 }
  0x2b   :  { %135 = vmatmul.bf16.vlgmr.msra.gmra.mxu0 %v367_v8  ;;  %264 = vmatpush.bf16.msra.mxu1 %v376_v23 }
  0xa8   :  { %v136_v12 = vpop.f32.mrf.mxu0 }
  0xb0   :  { %v138_v15 = vpop.f32.mrf.mxu0 }
  0xb1   :  { %v141_v16 = vadd.f32 %v138_v15, %v136_v12 }
  0xb3   :  { %v142_v18 = vrot.slane %v141_v16, 4 }
  0xb5   :  { %v143_v19 = vadd.f32 %v142_v18, %v141_v16 }
  0xb7   :  { %v144_v21 = vrot.slane %v143_v19, 2 }
  0xb9   :  { %v145_v22 = vadd.f32 %v144_v21, %v143_v19 }
  0xbb   :  { %v146_v24 = vrot.slane %v145_v22, 1 }
  0xbd   :  { %v147_v25 = vadd.f32 %v146_v24, %v145_v22 }
  0xbf   :  { %v148_v26 = vmul.f32 0.125, %v147_v25 }
  0xc1   :  { %v154_v27 = vsub.f32 %v136_v12, %v148_v26 }
  0xc3   :  { %v158_v28 = vmul.f32 %v154_v27, %v154_v27 }
  0xc5   :  { %v161_v29 = vrot.slane %v158_v28, 4 }
  0xc7   :  { %v162_v30 = vadd.f32 %v161_v29, %v158_v28 }
  0xc9   :  { %v163_v31 = vrot.slane %v162_v30, 2 }
  0xcb   :  { %v164_v32 = vadd.f32 %v163_v31, %v162_v30 }
  0xcd   :  { %v165_v33 = vrot.slane %v164_v32, 1 }
  0xcf   :  { %v166_v34 = vadd.f32 %v165_v33, %v164_v32 }
  0xd1   :  { %v167_v35 = vmul.f32 0.125, %v166_v34 }
  0xd3   :  { %v168_v36 = vadd.f32 1e-05, %v167_v35 }
  0xd5   :  { %390 = vrsqrt.f32 %v168_v36  ;;  %vm175_vm1 = vweird.f32 %v168_v36 }
  0xdb   :  { %v391_v37 = vpop.eup %390 }
  0xdc   :  { %v170_v38 = vmul.f32 %v391_v37, %v168_v36  ;;  %vm176_vm0 = vweird.f32 %v391_v37 }
  0xdd   :  { %vm177_vm2 = vmor %vm175_vm1, %vm176_vm0 }
  0xde   :  { %v171_v39 = vmul.f32 %v391_v37, %v170_v38 }
  0xe0   :  { %v172_v40 = vmul.f32 0.5, %v171_v39 }
  0xe2   :  { %v173_v41 = vsub.f32 1.5, %v172_v40 }
  0xe4   :  { %v174_v42 = vmul.f32 %v391_v37, %v173_v41 }
  0xe6   :  { %v178_v44 = vsel %vm177_vm2, %v391_v37, %v174_v42 }
  0xe7   :  { %v180_v45 = vmul.f32 %v179_v43, %v178_v44 }
  0xe9   :  { %v181_v46 = vperm.slane %v180_v45, 0 }
  0xeb   :  { %v182_v48 = vmul.f32 %v181_v46, %v154_v27  ;;  %v183_v49 = vmul.f32 0.0, %v181_v46 }
  0xed   :  { %v188_v50 = vadd.f32 %v388_v47, %v182_v48  ;;  %v189_v51 = vadd.f32 %v388_v47, %v183_v49 }
  0xef   :  { %v190_v52 = vmax.f32 %v188_v50, 0.0  ;;  %v191_v53 = vmax.f32 %v189_v51, 0.0 }
  0xf1   :  { %v192_v54 = vpack.c.bf16 %v191_v53, %v190_v52 }
  0xf3   :  { %265 = vmatmul.bf16.vlgmr.msra.gmra.mxu1 %v192_v54 }
 0x170   :  { %v266_v56 = vpop.f32.mrf.mxu1 }
 0x171   :  { %v279_v57 = vadd.f32 %v389_v55, %v266_v56 }
 0x173   :  { %281 = vst [vmem:[%s513_s6] sm:$0xff] %v279_v57 }
 0x178   :  { %v268_v58 = vpop.f32.mrf.mxu1 }
 0x179   :  { %v280_v59 = vadd.f32 %v389_v55, %v268_v58 }
 0x17b   :  { %282 = vst [vmem:[%s513_s6 + $0x8] sm:$0xff] %v280_v59 }
 0x17c   :  { %297 = vsyncpa [#allocation3], 1 }
 0x17d   :  { %298 = vsyncpa [#allocation5], 1 }

</bundles_post_ra>
